<compile_context>
chip_gen: v5e
topology: v5e:2x2
jax: 0.10.0
libtpu: 0.0.40
codegen_flags: <defaults>
</compile_context>

<pallas_src>
import functools

import jax
import jax.numpy as jnp
from jax.experimental import pallas as pl
from jax.experimental.pallas import tpu as pltpu


def _round_up(n, m):
    return -(-n // m) * m


_NEG_BIG = -1.0e30  # finite "-inf" for masking padded logit lanes


def classifier_kernel(x_ref, w_ref, b_ref, o_ref, *, D_pad, C, C_pad):
    """x: (B_pad, D_pad) bf16; w: (D_pad + C_pad, C_pad) bf16; b: (8, C_pad) f32;
    o: (B_pad, C_pad) f32 softmax probabilities (valid in the first C lanes)."""
    x = x_ref[...]                                   # (B, D_pad) bf16

    # Static, 8-row-aligned views into the lane-dense weight slab ((in, out) layout).
    w1 = w_ref[:D_pad, :]                            # (D_pad, C_pad) bf16
    w2 = w_ref[D_pad:D_pad + C_pad, :]               # (C_pad, C_pad) bf16
    b1 = b_ref[0:1, :]                               # (1, C_pad) f32
    b2 = b_ref[1:2, :]                               # (1, C_pad) f32

    # linear1 + relu  (bf16 MXU operands, f32 accumulation; bias/ReLU in f32)
    h = jnp.dot(x, w1, preferred_element_type=jnp.float32) + b1
    h = jnp.maximum(h, 0.0)

    # linear2
    logits = jnp.dot(h.astype(jnp.bfloat16), w2,
                     preferred_element_type=jnp.float32) + b2

    # Mask the padded class lanes out of the softmax, then numerically-stable softmax.
    col = jax.lax.broadcasted_iota(jnp.int32, logits.shape, 1)
    logits = jnp.where(col < C, logits, _NEG_BIG)
    m = jnp.max(logits, axis=-1, keepdims=True)
    e = jnp.exp(logits - m)                          # padded lanes -> exp(<<0) == 0
    denom = jnp.sum(e, axis=-1, keepdims=True)
    o_ref[...] = (e / denom).astype(o_ref.dtype)     # exact normalization


def make_classifier_forward(w1, b1, w2, b2):
    """Pack PyTorch-layout params (w1:(C,D), b1:(C,), w2:(C,C), b2:(C,)) once and
    return a jitted forward: x (B, D) -> (B, C) class probabilities (float32)."""
    C, D = int(w1.shape[0]), int(w1.shape[1])
    D_pad = _round_up(D, 8)          # sublane-aligned contraction dim
    C_pad = 128                      # lane-dense class dim
    assert C <= C_pad, "number_of_classes > 128 needs a tiled class dimension"

    # One-time lane-dense packing (outside the per-call forward). Transposed to
    # (in, out) layout here so the kernel consumes row-major operands directly.
    w_slab = jnp.zeros((D_pad + C_pad, C_pad), jnp.float32)
    w_slab = w_slab.at[:D, :C].set(jnp.asarray(w1, jnp.float32).T)
    w_slab = w_slab.at[D_pad:D_pad + C, :C].set(jnp.asarray(w2, jnp.float32).T)
    w_slab = jax.block_until_ready(w_slab.astype(jnp.bfloat16))

    b_slab = jnp.zeros((8, C_pad), jnp.float32)
    b_slab = b_slab.at[0, :C].set(jnp.asarray(b1, jnp.float32))
    b_slab = b_slab.at[1, :C].set(jnp.asarray(b2, jnp.float32))
    b_slab = jax.block_until_ready(b_slab)

    kernel = functools.partial(classifier_kernel, D_pad=D_pad, C=C, C_pad=C_pad)

    @jax.jit
    def forward(x):
        x = jnp.asarray(x, jnp.float32)
        B = x.shape[0]
        B_pad = max(_round_up(B, 8), 8)              # full sublane tile
        # Zero-pad batch rows / contraction columns; cast the MXU operand to bf16
        # (halves the x DMA bytes; accumulation stays f32 inside the kernel).
        x_p = jnp.zeros((B_pad, D_pad), jnp.float32).at[:B, :D].set(x)
        x_p = x_p.astype(jnp.bfloat16)

        out = pl.pallas_call(
            kernel,
            out_shape=jax.ShapeDtypeStruct((B_pad, C_pad), jnp.float32),
            in_specs=[
                pl.BlockSpec(memory_space=pltpu.MemorySpace.VMEM),  # x
                pl.BlockSpec(memory_space=pltpu.MemorySpace.VMEM),  # weight slab (bf16)
                pl.BlockSpec(memory_space=pltpu.MemorySpace.VMEM),  # bias slab (f32)
            ],
            out_specs=pl.BlockSpec(memory_space=pltpu.MemorySpace.VMEM),
        )(x_p, w_slab, b_slab)
        return out[:B, :C]

    return forward


def kaiming_normal(key, out_features, in_features):
    # torch.nn.init.kaiming_normal_ default: fan_in mode, a=0 -> std = sqrt(2/fan_in)
    std = jnp.sqrt(2.0 / in_features)
    return jax.random.normal(key, (out_features, in_features), jnp.float32) * std


if __name__ == "__main__":
    latent_dim = 32
    number_of_classes = 8
    batch = 4

    key = jax.random.PRNGKey(0)
    kx, k1, k2 = jax.random.split(key, 3)

    # Deterministic parameter init mirroring linear_weights_kaiming_init.
    w1 = kaiming_normal(k1, number_of_classes, latent_dim)          # linear1.weight (C, D)
    b1 = jnp.zeros((number_of_classes,), jnp.float32)               # linear1.bias
    w2 = kaiming_normal(k2, number_of_classes, number_of_classes)   # linear2.weight (C, C)
    b2 = jnp.zeros((number_of_classes,), jnp.float32)               # linear2.bias

    x = jax.random.normal(kx, (batch, latent_dim), jnp.float32)

    forward = make_classifier_forward(w1, b1, w2, b2)
    out = jax.block_until_ready(forward(x))

    # Sanity check against a plain-JAX f32 reference (tolerance sized for the bf16
    # MXU operands; normalization itself is exact so rows sum to 1 to f32 rounding).
    h_ref = jnp.maximum(x @ w1.T + b1, 0.0)
    ref = jax.nn.softmax(h_ref @ w2.T + b2, axis=-1)
    assert out.shape == (batch, number_of_classes)
    assert jnp.allclose(out, ref, atol=2e-2, rtol=2e-2)
    assert jnp.allclose(jnp.sum(out, axis=-1), 1.0, atol=1e-5)
    assert jnp.array_equal(jnp.argmax(out, axis=-1), jnp.argmax(ref, axis=-1))

    print("KERNEL_OK")
</pallas_src>

<mosaic_0001>
module attributes {stable_mosaic.version = 11 : i64} {
  func.func @classifier_kernel(%arg0: memref<8x32xbf16, #tpu.memory_space<vmem>>, %arg1: memref<160x128xbf16, #tpu.memory_space<vmem>>, %arg2: memref<8x128xf32, #tpu.memory_space<vmem>>, %arg3: memref<8x128xf32, #tpu.memory_space<vmem>>) attributes {dimension_semantics = [], scalar_prefetch = 0 : i64, scratch_operands = 0 : i64, tpu.core_type = #tpu.core_type<tc>} {
    %c0 = arith.constant 0 : index
    %c0_0 = arith.constant 0 : index
    %0 = vector.load %arg0[%c0, %c0_0] : memref<8x32xbf16, #tpu.memory_space<vmem>>, vector<8x32xbf16>
    %c0_1 = arith.constant 0 : index
    %c0_2 = arith.constant 0 : index
    %1 = vector.load %arg1[%c0_1, %c0_2] : memref<160x128xbf16, #tpu.memory_space<vmem>>, vector<32x128xbf16>
    %c32 = arith.constant 32 : index
    %c0_3 = arith.constant 0 : index
    %2 = vector.load %arg1[%c32, %c0_3] : memref<160x128xbf16, #tpu.memory_space<vmem>>, vector<128x128xbf16>
    %c0_4 = arith.constant 0 : index
    %c0_5 = arith.constant 0 : index
    %3 = vector.load %arg2[%c0_4, %c0_5] : memref<8x128xf32, #tpu.memory_space<vmem>>, vector<1x128xf32>
    %c1 = arith.constant 1 : index
    %c0_6 = arith.constant 0 : index
    %4 = vector.load %arg2[%c1, %c0_6] : memref<8x128xf32, #tpu.memory_space<vmem>>, vector<1x128xf32>
    %cst = arith.constant dense<0.000000e+00> : vector<8x128xf32>
    %5 = tpu.matmul %0, %1, %cst {dimension_numbers = #tpu.dot_dimension_numbers<[1], [0], [0], [1], [0, 0, 1, 1], [], []>} : vector<8x32xbf16>, vector<32x128xbf16>, vector<8x128xf32> -> vector<8x128xf32>
    %6 = vector.broadcast %3 : vector<1x128xf32> to vector<8x128xf32>
    %7 = arith.addf %5, %6 : vector<8x128xf32>
    %cst_7 = arith.constant 0.000000e+00 : f32
    %8 = vector.broadcast %cst_7 : f32 to vector<8x128xf32>
    %9 = arith.maximumf %7, %8 : vector<8x128xf32>
    %10 = arith.truncf %9 : vector<8x128xf32> to vector<8x128xbf16>
    %cst_8 = arith.constant dense<0.000000e+00> : vector<8x128xf32>
    %11 = tpu.matmul %10, %2, %cst_8 {dimension_numbers = #tpu.dot_dimension_numbers<[1], [0], [0], [1], [0, 0, 1, 1], [], []>} : vector<8x128xbf16>, vector<128x128xbf16>, vector<8x128xf32> -> vector<8x128xf32>
    %12 = vector.broadcast %4 : vector<1x128xf32> to vector<8x128xf32>
    %13 = arith.addf %11, %12 : vector<8x128xf32>
    %14 = tpu.iota {dimensions = array<i32: 1>} : vector<8x128xi32>
    %c8_i32 = arith.constant 8 : i32
    %15 = vector.broadcast %c8_i32 : i32 to vector<8x128xi32>
    %16 = arith.cmpi slt, %14, %15 : vector<8x128xi32>
    %cst_9 = arith.constant -1.000000e+30 : f32
    %17 = vector.broadcast %cst_9 : f32 to vector<8x128xf32>
    %18 = arith.select %16, %13, %17 : vector<8x128xi1>, vector<8x128xf32>
    %cst_10 = arith.constant dense<0xFF800000> : vector<8xf32>
    %19 = vector.multi_reduction <maximumf>, %18, %cst_10 [1] : vector<8x128xf32> to vector<8xf32>
    %20 = vector.shape_cast %19 : vector<8xf32> to vector<8x1xf32>
    %21 = vector.broadcast %20 : vector<8x1xf32> to vector<8x128xf32>
    %22 = arith.subf %18, %21 : vector<8x128xf32>
    %23 = math.exp %22 : vector<8x128xf32>
    %cst_11 = arith.constant dense<0.000000e+00> : vector<8xf32>
    %24 = vector.multi_reduction <add>, %23, %cst_11 [1] : vector<8x128xf32> to vector<8xf32>
    %25 = vector.shape_cast %24 : vector<8xf32> to vector<8x1xf32>
    %26 = vector.broadcast %25 : vector<8x1xf32> to vector<8x128xf32>
    %27 = arith.divf %23, %26 : vector<8x128xf32>
    %c0_12 = arith.constant 0 : index
    %c0_13 = arith.constant 0 : index
    %28 = vector.load %arg3[%c0_12, %c0_13] : memref<8x128xf32, #tpu.memory_space<vmem>>, vector<8x128xf32>
    tpu.vector_store %arg3[%c0_12, %c0_13], %27 {strides = array<i32>} : memref<8x128xf32, #tpu.memory_space<vmem>>, vector<8x128xf32>,
    return
  }
}

</mosaic_0001>

<bundles_post_ra>
// kernel: forward.1
= control target key start
LH: loop header
LB: loop body
LE: loop exit
PB: predicated region body
PF: predicated region fallthrough
CT: control target
= control target key end

     0   :  { %8 = vsyncpa [#allocation3], 0  ;;  %s266_s15 = smov [#allocation2]   ;;  %s267_s17 = smov 64   ;;  %s304_s0 = inlined_call_operand.vmem [shape: bf16[8,32], index: 0, kind: input, shape index: {}]   ;;  %s305_s1 = inlined_call_operand.hbm [shape: bf16[160,128], index: 1, kind: input, shape index: {}]   ;;  %s306_s2 = inlined_call_operand.vmem [shape: f32[8,128], index: 2, kind: input, shape index: {}]   ;;  %s307_s3 = inlined_call_operand.vmem [shape: f32[8,128], index: 3, kind: output, shape index: {}]  }
   0x1   :  { %s15_s14 = sshll.u32 %s305_s1, 4  ;;  %s17_s16 = sshll.u32 %s266_s15, 4  ;;  %s16_s14 = int_to_ptr.hbm [resolvable:$true] %s15_s14  ;;  %s18_s16 = int_to_ptr.vmem [resolvable:$true] %s17_s16 }
   0x2   :  { %s268_s18 = smov 4  }
   0x3   :  { %23 = dma.hbm_to_vmem [thread:$0]  %s16_s14, 1280, %s18_s16, [#allocation3], %s267_s17, %s267_s17, %s268_s18  }
   0x4   :  { %264 = dma.done.wait [#allocation3], 1280  }
   0x5   :  { %265 = vsyncadd [#allocation3], 4294966016  ;;  %v222_v0 = vld [vmem:[#allocation2 + $0x8] sm:$0xff]  ;;  %v221_v2 = vld [vmem:[#allocation2] sm:$0xff]  ;;  %vm67_vm0 = vcmask 261120   ;;  %v148_v17 = vlaneseq }
   0x6   :  { %v230_v1 = vld [vmem:[#allocation2 + $0x48] sm:$0xff]  ;;  %77 = vmatpush.bf16.msra.mxu0 %v222_v0  ;;  %v229_v3 = vld [vmem:[#allocation2 + $0x40] sm:$0xff]  ;;  %v228_v5 = vld [vmem:[#allocation2 + $0x38] sm:$0xff] }
   0x7   :  { %135 = vmatpush.bf16.msra.mxu1 %v230_v1  ;;  %v31_v4 = vld [vmem:[%s304_s0] sm:$0xf]  ;;  %v227_v6 = vld [vmem:[#allocation2 + $0x30] sm:$0xff]  ;;  %v226_v7 = vld [vmem:[#allocation2 + $0x28] sm:$0xff]  ;;  %v149_v18 = vand.u32 127, %v148_v17 }
   0x8   :  { %v225_v8 = vld [vmem:[#allocation2 + $0x20] sm:$0xff]  ;;  %v224_v9 = vld [vmem:[#allocation2 + $0x18] sm:$0xff]  ;;  %v223_v10 = vld [vmem:[#allocation2 + $0x10] sm:$0xff] }
   0x9   :  { %v234_v11 = vld [vmem:[%s306_s2] ss:$0 sm:$0xff]  ;;  %v235_v19 = vld [vmem:[%s306_s2 + $0x1] ss:$0 sm:$0xff]  ;;  %vm150_vm1 = vcmp.lt.s32.totalorder %v149_v18, 8 }
   0xa   :  { %78 = vmatpush.bf16.msra.mxu0 %v221_v2 }
   0xb   :  { %136 = vmatpush.bf16.msra.mxu1 %v229_v3 }
   0xd   :  { %188 = vmatmul.msk.bf16.vlgmr.msra.gmra.mxu0 %vm67_vm0, %v31_v4 }
   0xf   :  { %137 = vmatpush.bf16.msra.mxu1 %v228_v5 }
  0x13   :  { %138 = vmatpush.bf16.msra.mxu1 %v227_v6 }
  0x17   :  { %139 = vmatpush.bf16.msra.mxu1 %v226_v7 }
  0x1b   :  { %140 = vmatpush.bf16.msra.mxu1 %v225_v8 }
  0x1f   :  { %141 = vmatpush.bf16.msra.mxu1 %v224_v9 }
  0x23   :  { %142 = vmatpush.bf16.msra.mxu1 %v223_v10 }
  0x8a   :  { %v80_v12 = vpop.f32.mrf.mxu0 }
  0x8b   :  { %v81_v13 = vadd.f32 %v234_v11, %v80_v12 }
  0x8d   :  { %v84_v14 = vmax.f32 %v81_v13, 0.0 }
  0x8f   :  { %v85_v15 = vpack.c.bf16 %v84_v14, %v84_v14 }
  0x91   :  { %143 = vmatmul.bf16.vlgmr.msra.gmra.mxu1 %v85_v15 }
  0x92   :  { %v82_v16 = vpop.f32.mrf.mxu0 }
 0x10e   :  { %v144_v20 = vpop.f32.mrf.mxu1 }
 0x10f   :  { %v145_v21 = vadd.f32 %v235_v19, %v144_v20 }
 0x111   :  { %v151_v22 = vsel %vm150_vm1, %v145_v21, -1e+30 }
 0x112   :  { %152 = vmax.xlane.f32.xlu0 %v151_v22 }
 0x116   :  { %v146_v23 = vpop.f32.mrf.mxu1 }
 0x185   :  { %v153_v24 = vpop.xlane.xlu0 %152 }
 0x186   :  { %v154_v25 = vsub.f32 %v151_v22, %v153_v24 }
 0x188   :  { %v155_v26 = vmul.f32 1.442695, %v154_v25 }
 0x18a   :  { %236 = vpow2.f32 %v155_v26 }
 0x190   :  { %v237_v27 = vpop.eup %236 }
 0x191   :  { %157 = vadd.xlane.f32.xlu0 %v237_v27 }
 0x204   :  { %v158_v28 = vpop.xlane.xlu0 %157 }
 0x205   :  { %238 = vrcp.f32 %v158_v28  ;;  %v170_v32 = vand.u32 2147483648, %v158_v28  ;;  %v168_v34 = vand.u32 2147483647, %v158_v28  ;;  %vm164_vm3 = vweird.f32 %v158_v28 }
 0x207   :  { %v171_v36 = vor.u32 1.1754944e-38, %v170_v32  ;;  %vm169_vm5 = vcmp.eq.f32.partialorder %v168_v34, 8.507059e+37 }
 0x20b   :  { %v239_v29 = vpop.eup %238 }
 0x20c   :  { %v160_v30 = vmul.f32 %v239_v29, %v158_v28  ;;  %vm165_vm2 = vweird.f32 %v239_v29 }
 0x20d   :  { %vm166_vm4 = vmor %vm164_vm3, %vm165_vm2 }
 0x20e   :  { %v161_v31 = vsub.f32 1.0, %v160_v30 }
 0x210   :  { %v162_v33 = vmul.f32 %v239_v29, %v161_v31 }
 0x212   :  { %v163_v35 = vadd.f32 %v239_v29, %v162_v33 }
 0x214   :  { %v167_v37 = vsel %vm166_vm4, %v239_v29, %v163_v35 }
 0x215   :  { %v172_v38 = vsel %vm169_vm5, %v171_v36, %v167_v37 }
 0x216   :  { %v173_v39 = vmul.f32 %v237_v27, %v172_v38 }
 0x218   :  { %174 = vst [vmem:[%s307_s3] sm:$0xff] %v173_v39 }
 0x219   :  { %179 = vsyncpa [#allocation3], 1 }

</bundles_post_ra>
